<compile_context>
chip_gen: v7x
topology: tpu7x:2x2x1
jax: 0.10.0
libtpu: 0.0.40
codegen_flags: <defaults>
</compile_context>

<pallas_src>
import jax
import jax.numpy as jnp
from jax.experimental import pallas as pl
from jax.experimental.pallas import tpu as pltpu


def mlp_kernel(x_ref, w1_ref, b1_ref, w2_ref, b2_ref, w3_ref, b3_ref, o_ref):
    x = x_ref[...]                                                      # (in, tb) bf16
    # fc1 + relu  (f32 accumulate, f32 bias/ReLU)
    h1 = jnp.dot(w1_ref[...], x, preferred_element_type=jnp.float32)   # (64, tb)
    h1 = jnp.maximum(h1 + b1_ref[...], 0.0)
    # fc2 + relu
    h2 = jnp.dot(w2_ref[...], h1.astype(jnp.bfloat16),
                 preferred_element_type=jnp.float32)                   # (32, tb)
    h2 = jnp.maximum(h2 + b2_ref[...], 0.0)
    # fc3 (out_features = 1): VPU elementwise-mul + sublane reduce -> (1, tb),
    # keeps the MXU free and the result lane-dense.
    h3 = jnp.sum(h2 * w3_ref[...], axis=0, keepdims=True) + b3_ref[...]
    o_ref[...] = h3.astype(o_ref.dtype)


def mlp_forward(x, w1, b1, w2, b2, w3t, b3, tile_b=1024):
    """x: (B, in) f32. Weights in PyTorch (out, in) layout; w3t is (32, 1)."""
    B, in_size = x.shape
    tile_b = min(tile_b, pl.cdiv(B, 128) * 128)          # shrink tile for tiny batches
    n_tiles = pl.cdiv(B, tile_b)
    b_pad = n_tiles * tile_b

    # Layout plumbing in the wrapper: transpose + pad batch to a lane multiple.
    x_t = jnp.pad(x.T.astype(jnp.bfloat16), ((0, 0), (0, b_pad - B)))  # (in, b_pad)
    w1_bf = w1.astype(jnp.bfloat16)
    w2_bf = w2.astype(jnp.bfloat16)

    def const_spec(a):
        return pl.BlockSpec(a.shape, lambda i: (0,) * a.ndim)

    out_t = pl.pallas_call(
        mlp_kernel,
        out_shape=jax.ShapeDtypeStruct((1, b_pad), jnp.float32),
        grid=(n_tiles,),
        in_specs=[
            pl.BlockSpec((in_size, tile_b), lambda i: (0, i)),   # x tile (streams)
            const_spec(w1_bf), const_spec(b1),                   # weights/biases resident
            const_spec(w2_bf), const_spec(b2),
            const_spec(w3t), const_spec(b3),
        ],
        out_specs=pl.BlockSpec((1, tile_b), lambda i: (0, i)),   # lane-dense output slab
        compiler_params=pltpu.CompilerParams(
            dimension_semantics=("parallel",)),
    )(x_t, w1_bf, b1, w2_bf, b2, w3t, b3)

    return out_t[:, :B].T                                        # (B, 1)


def init_params(key, input_size):
    # PyTorch nn.Linear default init: U(-1/sqrt(fan_in), 1/sqrt(fan_in)),
    # weights stored in PyTorch (out, in) layout (kernel computes y^T = W @ x^T).
    def linear(key, fan_in, fan_out):
        k_w, k_b = jax.random.split(key)
        bound = 1.0 / jnp.sqrt(fan_in)
        w = jax.random.uniform(k_w, (fan_out, fan_in), jnp.float32, -bound, bound)
        b = jax.random.uniform(k_b, (fan_out, 1), jnp.float32, -bound, bound)
        return w, b

    k1, k2, k3 = jax.random.split(key, 3)
    w1, b1 = linear(k1, input_size, 64)
    w2, b2 = linear(k2, 64, 32)
    w3, b3 = linear(k3, 32, 1)
    return w1, b1, w2, b2, w3.T, b3                              # w3 passed as (32, 1)


def reference_forward(x, w1, b1, w2, b2, w3t, b3):
    # Pure-JAX reference mirroring the kernel's numerics (bf16 operands, f32 acc).
    xb = x.astype(jnp.bfloat16)
    h1 = jnp.maximum(
        jnp.dot(xb, w1.astype(jnp.bfloat16).T,
                preferred_element_type=jnp.float32) + b1.T, 0.0)
    h2 = jnp.maximum(
        jnp.dot(h1.astype(jnp.bfloat16), w2.astype(jnp.bfloat16).T,
                preferred_element_type=jnp.float32) + b2.T, 0.0)
    return jnp.dot(h2, w3t) + b3.T


if __name__ == "__main__":
    key = jax.random.PRNGKey(0)
    k_x, k_p = jax.random.split(key)

    batch = 8
    input_size = 32
    x = jax.random.normal(k_x, (batch, input_size), jnp.float32)
    params = init_params(k_p, input_size)

    out = mlp_forward(x, *params)
    out = jax.block_until_ready(out)

    ref = reference_forward(x, *params)
    assert out.shape == (batch, 1), out.shape
    assert jnp.allclose(out, ref, atol=1e-2, rtol=1e-2), "mismatch vs reference"

    print("KERNEL_OK")
</pallas_src>

<mosaic_0001>
module attributes {stable_mosaic.version = 11 : i64} {
  func.func @mlp_kernel(%arg0: i32, %arg1: memref<32x128xbf16, #tpu.memory_space<vmem>>, %arg2: memref<64x32xbf16, #tpu.memory_space<vmem>>, %arg3: memref<64x1xf32, #tpu.memory_space<vmem>>, %arg4: memref<32x64xbf16, #tpu.memory_space<vmem>>, %arg5: memref<32x1xf32, #tpu.memory_space<vmem>>, %arg6: memref<32x1xf32, #tpu.memory_space<vmem>>, %arg7: memref<1x1xf32, #tpu.memory_space<vmem>>, %arg8: memref<1x128xf32, #tpu.memory_space<vmem>>) attributes {dimension_semantics = [#tpu.dimension_semantics<parallel>], iteration_bounds = array<i64: 1>, scalar_prefetch = 0 : i64, scratch_operands = 0 : i64, tpu.core_type = #tpu.core_type<tc>, window_params = [{transform_indices = @transform_0, window_bounds = array<i64: 32, 128>}, {pipeline_mode = #tpu.pipeline_mode<synchronous>, transform_indices = @transform_1, window_bounds = array<i64: 64, 32>}, {pipeline_mode = #tpu.pipeline_mode<synchronous>, transform_indices = @transform_2, window_bounds = array<i64: 64, 1>}, {pipeline_mode = #tpu.pipeline_mode<synchronous>, transform_indices = @transform_3, window_bounds = array<i64: 32, 64>}, {pipeline_mode = #tpu.pipeline_mode<synchronous>, transform_indices = @transform_4, window_bounds = array<i64: 32, 1>}, {pipeline_mode = #tpu.pipeline_mode<synchronous>, transform_indices = @transform_5, window_bounds = array<i64: 32, 1>}, {pipeline_mode = #tpu.pipeline_mode<synchronous>, transform_indices = @transform_6, window_bounds = array<i64: 1, 1>}, {transform_indices = @transform_7, window_bounds = array<i64: 1, 128>}]} {
    %c0 = arith.constant 0 : index
    %c0_0 = arith.constant 0 : index
    %0 = vector.load %arg1[%c0, %c0_0] : memref<32x128xbf16, #tpu.memory_space<vmem>>, vector<32x128xbf16>
    %c0_1 = arith.constant 0 : index
    %c0_2 = arith.constant 0 : index
    %1 = vector.load %arg2[%c0_1, %c0_2] : memref<64x32xbf16, #tpu.memory_space<vmem>>, vector<64x32xbf16>
    %cst = arith.constant dense<0.000000e+00> : vector<64x128xf32>
    %2 = tpu.matmul %1, %0, %cst {dimension_numbers = #tpu.dot_dimension_numbers<[1], [0], [0], [1], [0, 0, 1, 1], [], []>} : vector<64x32xbf16>, vector<32x128xbf16>, vector<64x128xf32> -> vector<64x128xf32>
    %c0_3 = arith.constant 0 : index
    %c0_4 = arith.constant 0 : index
    %3 = vector.load %arg3[%c0_3, %c0_4] : memref<64x1xf32, #tpu.memory_space<vmem>>, vector<64x1xf32>
    %4 = vector.broadcast %3 : vector<64x1xf32> to vector<64x128xf32>
    %5 = arith.addf %2, %4 : vector<64x128xf32>
    %cst_5 = arith.constant 0.000000e+00 : f32
    %6 = vector.broadcast %cst_5 : f32 to vector<64x128xf32>
    %7 = arith.maximumf %5, %6 : vector<64x128xf32>
    %c0_6 = arith.constant 0 : index
    %c0_7 = arith.constant 0 : index
    %8 = vector.load %arg4[%c0_6, %c0_7] : memref<32x64xbf16, #tpu.memory_space<vmem>>, vector<32x64xbf16>
    %9 = arith.truncf %7 : vector<64x128xf32> to vector<64x128xbf16>
    %cst_8 = arith.constant dense<0.000000e+00> : vector<32x128xf32>
    %10 = tpu.matmul %8, %9, %cst_8 {dimension_numbers = #tpu.dot_dimension_numbers<[1], [0], [0], [1], [0, 0, 1, 1], [], []>} : vector<32x64xbf16>, vector<64x128xbf16>, vector<32x128xf32> -> vector<32x128xf32>
    %c0_9 = arith.constant 0 : index
    %c0_10 = arith.constant 0 : index
    %11 = vector.load %arg5[%c0_9, %c0_10] : memref<32x1xf32, #tpu.memory_space<vmem>>, vector<32x1xf32>
    %12 = vector.broadcast %11 : vector<32x1xf32> to vector<32x128xf32>
    %13 = arith.addf %10, %12 : vector<32x128xf32>
    %cst_11 = arith.constant 0.000000e+00 : f32
    %14 = vector.broadcast %cst_11 : f32 to vector<32x128xf32>
    %15 = arith.maximumf %13, %14 : vector<32x128xf32>
    %c0_12 = arith.constant 0 : index
    %c0_13 = arith.constant 0 : index
    %16 = vector.load %arg6[%c0_12, %c0_13] : memref<32x1xf32, #tpu.memory_space<vmem>>, vector<32x1xf32>
    %17 = vector.broadcast %16 : vector<32x1xf32> to vector<32x128xf32>
    %18 = arith.mulf %15, %17 : vector<32x128xf32>
    %cst_14 = arith.constant dense<0.000000e+00> : vector<128xf32>
    %19 = vector.multi_reduction <add>, %18, %cst_14 [0] : vector<32x128xf32> to vector<128xf32>
    %20 = vector.shape_cast %19 : vector<128xf32> to vector<1x128xf32>
    %c0_15 = arith.constant 0 : index
    %c0_16 = arith.constant 0 : index
    %21 = vector.load %arg7[%c0_15, %c0_16] : memref<1x1xf32, #tpu.memory_space<vmem>>, vector<1x1xf32>
    %22 = vector.broadcast %21 : vector<1x1xf32> to vector<1x128xf32>
    %23 = arith.addf %20, %22 : vector<1x128xf32>
    %c0_17 = arith.constant 0 : index
    %c0_18 = arith.constant 0 : index
    %24 = vector.load %arg8[%c0_17, %c0_18] : memref<1x128xf32, #tpu.memory_space<vmem>>, vector<1x128xf32>
    tpu.vector_store %arg8[%c0_17, %c0_18], %23 {strides = array<i32>} : memref<1x128xf32, #tpu.memory_space<vmem>>, vector<1x128xf32>,
    return
  }
  func.func @transform_0(%arg0: i32) -> (i32, i32) {
    %c0_i32 = arith.constant 0 : i32
    %c0_i32_0 = arith.constant 0 : i32
    return %c0_i32, %arg0 : i32, i32
  }
  func.func @transform_1(%arg0: i32) -> (i32, i32) {
    %c0_i32 = arith.constant 0 : i32
    %c0_i32_0 = arith.constant 0 : i32
    %c0_i32_1 = arith.constant 0 : i32
    return %c0_i32, %c0_i32_0 : i32, i32
  }
  func.func @transform_2(%arg0: i32) -> (i32, i32) {
    %c0_i32 = arith.constant 0 : i32
    %c0_i32_0 = arith.constant 0 : i32
    %c0_i32_1 = arith.constant 0 : i32
    return %c0_i32, %c0_i32_0 : i32, i32
  }
  func.func @transform_3(%arg0: i32) -> (i32, i32) {
    %c0_i32 = arith.constant 0 : i32
    %c0_i32_0 = arith.constant 0 : i32
    %c0_i32_1 = arith.constant 0 : i32
    return %c0_i32, %c0_i32_0 : i32, i32
  }
  func.func @transform_4(%arg0: i32) -> (i32, i32) {
    %c0_i32 = arith.constant 0 : i32
    %c0_i32_0 = arith.constant 0 : i32
    %c0_i32_1 = arith.constant 0 : i32
    return %c0_i32, %c0_i32_0 : i32, i32
  }
  func.func @transform_5(%arg0: i32) -> (i32, i32) {
    %c0_i32 = arith.constant 0 : i32
    %c0_i32_0 = arith.constant 0 : i32
    %c0_i32_1 = arith.constant 0 : i32
    return %c0_i32, %c0_i32_0 : i32, i32
  }
  func.func @transform_6(%arg0: i32) -> (i32, i32) {
    %c0_i32 = arith.constant 0 : i32
    %c0_i32_0 = arith.constant 0 : i32
    %c0_i32_1 = arith.constant 0 : i32
    return %c0_i32, %c0_i32_0 : i32, i32
  }
  func.func @transform_7(%arg0: i32) -> (i32, i32) {
    %c0_i32 = arith.constant 0 : i32
    %c0_i32_0 = arith.constant 0 : i32
    return %c0_i32, %arg0 : i32, i32
  }
}

</mosaic_0001>

<bundles_post_ra>
// kernel: tpu_custom_call.1
= control target key start
LH: loop header
LB: loop body
LE: loop exit
PB: predicated region body
PF: predicated region fallthrough
CT: control target
= control target key end

     0   :  { %s594_s0 = inlined_call_operand.vmem [shape: bf16[32,128], index: 0, kind: input, shape index: {}]   ;;  %s595_s1 = inlined_call_operand.vmem [shape: bf16[64,32], index: 1, kind: input, shape index: {}]   ;;  %s596_s2 = inlined_call_operand.vmem [shape: f32[64,1], index: 2, kind: input, shape index: {}]   ;;  %s597_s3 = inlined_call_operand.vmem [shape: bf16[32,64], index: 3, kind: input, shape index: {}]   ;;  %s598_s4 = inlined_call_operand.vmem [shape: f32[32,1], index: 4, kind: input, shape index: {}]   ;;  %s599_s5 = inlined_call_operand.vmem [shape: f32[32,1], index: 5, kind: input, shape index: {}]   ;;  %s600_s6 = inlined_call_operand.<no memory space> [shape: f32[1,1], index: 6, kind: input, shape index: {}]   ;;  %s601_s7 = inlined_call_operand.hbm [shape: f32[1,128], index: 7, kind: output, shape index: {}]  }
   0x1   :  { %v12_v0 = vstv %s600_s6 }
   0x2   :  { %13 = vst [vmem:[#allocation2] sm:$0x1] %v12_v0 }
   0x3   :  { %v427_v1 = vld [vmem:[%s594_s0] sm:$0xff]   ;;  %vm122_vm0 = vcmask 261120   ;;  %v428_v2 = vld [vmem:[%s594_s0 + $0x8] sm:$0xff]   ;;  %v459_v4 = vmov 0   ;;  %v44_v7 = vld [vmem:[%s596_s2 + $0x10] sm:$0xff] }
   0x4   :  { %399 = vmatprep.subr.bf16.mxu0 %v427_v1  ;;  %v429_v3 = vld [vmem:[%s595_s1] sm:$0xff]   ;;  %425 = vset.pattern.permute.xlu0 %v459_v4  ;;  %v430_v5 = vld [vmem:[%s595_s1 + $0x8] sm:$0xff]   ;;  %v431_v8 = vld [vmem:[%s595_s1 + $0x10] sm:$0xff]  }
   0x5   :  { %400 = vmatpush3.bf16.msra.mxu0 %v427_v1  ;;  %426 = vset.pattern.permute.xlu1 %v459_v4  ;;  %v42_v6 = vld [vmem:[%s596_s2] sm:$0xff]  ;;  %v43_v9 = vld [vmem:[%s596_s2 + $0x8] sm:$0xff]  ;;  %v45_v10 = vld [vmem:[%s596_s2 + $0x18] sm:$0xff] }
   0x6   :  { %401 = vmatprep.subr.bf16.mxu0 %v428_v2  ;;  %403 = vmatprep.mubr.msk.bf16.mxu0 %vm122_vm0, %v429_v3  ;;  %v46_v11 = vld [vmem:[%s596_s2 + $0x20] sm:$0xff]  ;;  %v47_v12 = vld [vmem:[%s596_s2 + $0x28] sm:$0xff] }
   0x7   :  { %52 = vperm.xlu0 %425, %v42_v6   ;;  %62 = vperm.xlu1 %426, %v44_v7  }
   0x9   :  { %402 = vmatpush3.bf16.msra.mxu0 %v428_v2 }
   0xb   :  { %57 = vperm.xlu0 %425, %v43_v9   ;;  %67 = vperm.xlu1 %426, %v45_v10  }
   0xc   :  { %404 = vmatmul.mubr.msk.bf16.vlgmr.msra.gmra.mrb[0].mxu0 %vm122_vm0, %v430_v5 }
   0xd   :  { %407 = vmatprep.mubr.msk.bf16.mxu0 %vm122_vm0, %v431_v8 }
   0xe   :  { %14 = vsyncpa [#allocation4], 0  ;;  %v432_v13 = vld [vmem:[%s595_s1 + $0x18] sm:$0xff]   ;;  %v48_v14 = vld [vmem:[%s596_s2 + $0x30] sm:$0xff]  ;;  %vm250_vm1 = vcmask 523264  }
   0xf   :  { %72 = vperm.xlu0 %425, %v46_v11   ;;  %77 = vperm.xlu1 %426, %v47_v12   ;;  %v49_v15 = vld [vmem:[%s596_s2 + $0x38] sm:$0xff]  ;;  %v216_v16 = vld [vmem:[%s598_s4] sm:$0xff]  ;;  %v217_v17 = vld [vmem:[%s598_s4 + $0x8] sm:$0xff] }
  0x10   :  { %v218_v18 = vld [vmem:[%s598_s4 + $0x10] sm:$0xff]  ;;  %v219_v19 = vld [vmem:[%s598_s4 + $0x18] sm:$0xff]  ;;  %v310_v20 = vld [vmem:[%s599_s5] sm:$0xff] }
  0x11   :  { %v311_v21 = vld [vmem:[%s599_s5 + $0x8] sm:$0xff]  ;;  %v312_v22 = vld [vmem:[%s599_s5 + $0x10] sm:$0xff]  ;;  %v313_v23 = vld [vmem:[%s599_s5 + $0x18] sm:$0xff] }
  0x12   :  { %v347_v24 = vld [vmem:[#allocation2] sm:$0x1]  ;;  %v434_v62 = vld [vmem:[%s597_s3 + $0x8] sm:$0xff]  }
  0x13   :  { %82 = vperm.xlu0 %425, %v48_v14   ;;  %87 = vperm.xlu1 %426, %v49_v15   ;;  %v433_v25 = vld [vmem:[%s597_s3] sm:$0xff]   ;;  %s460_s3 = smov [#allocation3]  }
  0x14   :  { %408 = vmatmul.mubr.msk.bf16.gmra.mrb[4].mxu0 %vm122_vm0, %v432_v13  ;;  %419 = vmatprep.mubr.msk.bf16.mxu1 %vm250_vm1, %v433_v25  ;;  %v353_v25 = vlaneseq  ;;  %s365_s20 = sshll.u32 %s460_s3, 4  ;;  %s366_s20 = int_to_ptr.vmem [resolvable:$true] %s365_s20 }
  0x15   :  { %s435_s21 = scalar_lea.vmem %s366_s20, 16  ;;  %s439_s22 = scalar_lea.vmem %s366_s20, 32 }
  0x16   :  { %p436_p0 = scmp.ne.s32.totalorder %s366_s20, %s435_s21  ;;  %p440_p1 = scmp.lt.s32.totalorder %s366_s20, %s366_s20 }
  0x17   :  { %222 = vperm.xlu0 %425, %v216_v16   ;;  %227 = vperm.xlu1 %426, %v217_v17   ;;  %p441_p2 = scmp.lt.s32.totalorder %s439_s22, %s435_s21 }
  0x19   :  { %p442_p3 = por %p441_p2, %p440_p1 }
  0x1b   :  { %232 = vperm.xlu0 %425, %v218_v18   ;;  %237 = vperm.xlu1 %426, %v219_v19   ;;  %p443_p4 = pnand %p442_p3, %p436_p0 }
  0x1f   :  { %316 = vperm.xlu0 %425, %v310_v20   ;;  %321 = vperm.xlu1 %426, %v311_v21  }
  0x23   :  { %326 = vperm.xlu0 %425, %v312_v22   ;;  %331 = vperm.xlu1 %426, %v313_v23  }
  0x27   :  { %350 = vperm.xlu0 %425, %v347_v24  }
  0x86   :  { %v53_v26 = vpop.permute.xlu0 %52  ;;  %v63_v27 = vpop.permute.xlu1 %62 }
  0x8a   :  { %v58_v28 = vpop.permute.xlu0 %57  ;;  %v68_v29 = vpop.permute.xlu1 %67 }
  0x8e   :  { %v73_v33 = vpop.permute.xlu0 %72  ;;  %v78_v38 = vpop.permute.xlu1 %77 }
  0x92   :  { %v83_v45 = vpop.permute.xlu0 %82  ;;  %v88_v50 = vpop.permute.xlu1 %87 }
  0x96   :  { %v223_v63 = vpop.permute.xlu0 %222  ;;  %v228_v0 = vpop.permute.xlu1 %227 }
  0x9a   :  { %v233_v1 = vpop.permute.xlu0 %232  ;;  %v238_v2 = vpop.permute.xlu1 %237 }
  0x9e   :  { %v317_v8 = vpop.permute.xlu0 %316  ;;  %v322_v13 = vpop.permute.xlu1 %321 }
  0xa2   :  { %v327_v19 = vpop.permute.xlu0 %326  ;;  %v332_v22 = vpop.permute.xlu1 %331 }
  0xdf   :  { %v405_v30 = vpop.f32.mrb[0].mxu0 }
  0xe0   :  { %v178_v31 = vadd.f32 %v405_v30, %v63_v27  ;;  %v169_v32 = vpop.f32.mrb[1].mxu0 }
  0xe1   :  { %v170_v34 = vadd.f32 %v169_v32, %v53_v26  ;;  %v406_v35 = vpop.f32.mrb[2].mxu0 }
  0xe2   :  { %v181_v36 = vadd.f32 %v406_v35, %v68_v29  ;;  %v172_v37 = vpop.f32.mrb[3].mxu0  ;;  %v202_v40 = vmax.f32 %v178_v31, 0.0 }
  0xe3   :  { %v173_v39 = vadd.f32 %v172_v37, %v58_v28  ;;  %v200_v42 = vmax.f32 %v170_v34, 0.0  ;;  %v354_v28 = vshrl.u32 %v353_v25, 7 }
  0xe4   :  { %v203_v41 = vmax.f32 %v181_v36, 0.0 }
  0xe5   :  { %v201_v43 = vmax.f32 %v173_v39, 0.0  ;;  %v355_v31 = vsub.s32 0, %v354_v28 }
  0xe6   :  { %v213_v44 = vpack.c.bf16 %v203_v41, %v202_v40 }
  0xe7   :  { %v409_v46 = vpop.f32.mrb[4].mxu0  ;;  %v212_v47 = vpack.c.bf16 %v201_v43, %v200_v42 }
  0xe8   :  { %v194_v48 = vadd.f32 %v409_v46, %v83_v45  ;;  %v185_v49 = vpop.f32.mrb[5].mxu0 }
  0xe9   :  { %v186_v51 = vadd.f32 %v185_v49, %v73_v33  ;;  %v410_v52 = vpop.f32.mrb[6].mxu0  ;;  %411 = vmatprep.subr.bf16.mxu1 %v212_v47  ;;  %v351_v33 = vpop.permute.xlu0 %350 }
  0xea   :  { %v197_v53 = vadd.f32 %v410_v52, %v88_v50  ;;  %v188_v54 = vpop.f32.mrb[7].mxu0  ;;  %412 = vmatpush3.bf16.msra.mxu1 %v212_v47  ;;  %v206_v56 = vmax.f32 %v194_v48, 0.0  ;;  %v356_v35 = vrot.slane %v351_v33, %v355_v31 }
  0xeb   :  { %v189_v55 = vadd.f32 %v188_v54, %v78_v38  ;;  %413 = vmatprep.subr.bf16.mxu1 %v213_v44  ;;  %v204_v58 = vmax.f32 %v186_v51, 0.0 }
  0xec   :  { %v207_v57 = vmax.f32 %v197_v53, 0.0 }
  0xed   :  { %v205_v59 = vmax.f32 %v189_v55, 0.0 }
  0xee   :  { %v215_v60 = vpack.c.bf16 %v207_v57, %v206_v56  ;;  %414 = vmatpush3.bf16.msra.mxu1 %v213_v44 }
  0xef   :  { %v214_v61 = vpack.c.bf16 %v205_v59, %v204_v58 }
  0xf1   :  { %415 = vmatprep.subr.bf16.mxu1 %v214_v61 }
  0xf2   :  { %416 = vmatpush3.bf16.msra.mxu1 %v214_v61 }
  0xf3   :  { %417 = vmatprep.subr.bf16.mxu1 %v215_v60 }
  0xf6   :  { %418 = vmatpush3.bf16.msra.mxu1 %v215_v60 }
  0xf9   :  { %420 = vmatmul.mubr.msk.bf16.vlgmr.msra.gmra.mrb[0].mxu1 %vm250_vm1, %v434_v62 }
 0x1cc   :  { %v421_v3 = vpop.f32.mrb[0].mxu1 }
 0x1cd   :  { %v291_v4 = vpop.f32.mrb[1].mxu1  ;;  %v300_v5 = vadd.f32 %v421_v3, %v233_v1 }
 0x1ce   :  { %v292_v6 = vadd.f32 %v291_v4, %v223_v63  ;;  %v422_v7 = vpop.f32.mrb[2].mxu1 }
 0x1cf   :  { %v294_v9 = vpop.f32.mrb[3].mxu1  ;;  %v303_v11 = vadd.f32 %v422_v7, %v238_v2  ;;  %v308_v14 = vmax.f32 %v300_v5, 0.0 }
 0x1d0   :  { %v306_v10 = vmax.f32 %v292_v6, 0.0  ;;  %v295_v12 = vadd.f32 %v294_v9, %v228_v0 }
 0x1d1   :  { %v309_v17 = vmax.f32 %v303_v11, 0.0  ;;  %v336_v20 = vmul.f32 %v327_v19, %v308_v14 }
 0x1d2   :  { %v307_v15 = vmax.f32 %v295_v12, 0.0  ;;  %v334_v16 = vmul.f32 %v317_v8, %v306_v10 }
 0x1d3   :  { %v337_v23 = vmul.f32 %v332_v22, %v309_v17 }
 0x1d4   :  { %v335_v18 = vmul.f32 %v322_v13, %v307_v15 }
 0x1d6   :  { %v338_v21 = vadd.f32 %v335_v18, %v334_v16 }
 0x1d8   :  { %v339_v24 = vadd.f32 %v338_v21, %v336_v20 }
 0x1da   :  { %v340_v26 = vadd.f32 %v339_v24, %v337_v23 }
 0x1dc   :  { %v341_v27 = vrot.slane %v340_v26, 4 }
 0x1de   :  { %v342_v29 = vadd.f32 %v341_v27, %v340_v26 }
 0x1e0   :  { %v343_v30 = vrot.slane %v342_v29, 2 }
 0x1e2   :  { %v344_v32 = vadd.f32 %v343_v30, %v342_v29 }
 0x1e4   :  { %v345_v34 = vrot.slane %v344_v32, 1 }
 0x1e6   :  { %v346_v36 = vadd.f32 %v345_v34, %v344_v32 }
 0x1e8   :  { %v357_v37 = vadd.f32 %v356_v35, %v346_v36 }
 0x1ea   :  { %358 = vst [vmem:[#allocation3] sm:$0x1] %v357_v37 }
 0x1eb   :  { %446 = shalt.err (!%p443_p4)
}
 0x1ec   :  { %s447_s25 = scalar_lea.hbm %s601_s7, 16 }
 0x1ed   :  { %p448_p5 = scmp.ne.s32.totalorder %s601_s7, %s447_s25  ;;  %p451_p6 = scmp.lt.u32.totalorder %s447_s25, %s601_s7 }
 0x1ef   :  { %p453_p7 = pnand %p451_p6, %p448_p5 }
 0x1f1   :  { %456 = shalt.err (!%p453_p7)
}
 0x1f2   :  { %368 = dma.vmem_to_hbm [thread:$0]  %s366_s20, 16, %s601_s7, [#allocation4]  }
 0x1f3   :  { %457 = dma.done.wait [#allocation4], 16  }
 0x1f4   :  { %458 = vsyncadd [#allocation4], 4294967280 }
 0x1f5   :  { %372 = vsyncpa [#allocation4], 1 }

</bundles_post_ra>
